<compile_context>
chip_gen: v6e
topology: v6e:2x2x1
jax: 0.10.0
libtpu: 0.0.40
codegen_flags: <defaults>
</compile_context>

<pallas_src>
import functools

import jax
import jax.numpy as jnp
from jax import lax
from jax.experimental import pallas as pl
from jax.experimental.pallas import tpu as pltpu


def _cdiv(a, b):
    return -(-a // b)


def _round_up(x, m):
    return _cdiv(x, m) * m


# ----------------------------- Pallas kernel ------------------------------

def _wordchar_kernel(ids_ref, word_ref, tab_ref, b1_ref, b2_ref, out_ref,
                     y_ref, *, k1, k2):
    """One tile of TN words.

    ids_ref  : (TN, C)    int32 char ids
    word_ref : (TN, E)    f32 gathered word-embedding vectors (E = 2*Co)
    tab_ref  : (Vc, F)    fused table (bf16), F = (k1+k2)*Co; columns are the
                          per-branch / per-offset folded conv weights.
    b1_ref   : (1, Co)    f32 conv-1 bias
    b2_ref   : (1, Co)    f32 conv-2 bias
    out_ref  : (TN, E)    f32
    y_ref    : (C*TN, F)  f32 VMEM scratch; rows [c*TN:(c+1)*TN] hold the
                          fused conv pre-activations of char position c.
    """
    ids = ids_ref[...]                         # (TN, C) int32
    tn, c = ids.shape
    tab = tab_ref[...]                         # (Vc, F), loaded once
    vc = tab.shape[0]
    co = b1_ref.shape[1]

    # Fused char gather + both conv branches: per char position, one exact
    # one-hot (0/1 in bf16) @ folded table matmul (padding char id 0 maps to
    # the zero row of char_table -> zero contribution, exactly like PyTorch).
    iota = lax.broadcasted_iota(jnp.int32, (tn, vc), 1)      # (TN, Vc)
    for j in range(c):
        oh = (ids[:, j:j + 1] == iota).astype(tab.dtype)     # (TN, Vc) exact
        y_ref[j * tn:(j + 1) * tn, :] = jnp.dot(
            oh, tab, preferred_element_type=jnp.float32)     # (TN, F) f32

    def branch(col0, k, b_ref):
        p = c - k + 1                                        # valid positions
        # Shifted row-slice adds: row block t of `s` = conv pre-activation of
        # window position t (sum over the k in-window offsets).
        s = y_ref[0:p * tn, col0:col0 + co]
        for j in range(1, k):
            s = s + y_ref[j * tn:(j + p) * tn,
                          col0 + j * co:col0 + (j + 1) * co]
        # Running max over positions (row slices at multiples of TN only).
        m = s[0:tn, :]
        for t in range(1, p):
            m = jnp.maximum(m, s[t * tn:(t + 1) * tn, :])
        # Hoisted bias + ReLU (exact: max_t relu(x_t+b) == relu(max_t x_t + b)).
        return jnp.maximum(m + b_ref[...], 0.0)              # (TN, Co) f32

    c1 = branch(0, k1, b1_ref)
    c2 = branch(k1 * co, k2, b2_ref)
    char_vec = jnp.concatenate([c1, c2], axis=1)             # (TN, 2*Co)

    # concat=False path: char_vecs + word_vecs (dropout = identity, eval mode).
    out_ref[...] = (char_vec + word_ref[...]).astype(out_ref.dtype)


# ------------------------------- wrapper -----------------------------------

def _fold_char_table(char_table, conv_weights):
    """fused[:, blk] = char_table @ w[j*Ec:(j+1)*Ec, :] for every branch/offset."""
    ec = char_table.shape[1]
    blocks = []
    for w in conv_weights:
        k = w.shape[0] // ec
        for j in range(k):
            blocks.append(char_table.astype(jnp.float32)
                          @ w[j * ec:(j + 1) * ec, :].astype(jnp.float32))
    return jnp.concatenate(blocks, axis=1)                   # (Vc, (k1+k2)*Co)


def wordchar_embedding_forward(X, X_char, params, *, target_tile_n=512,
                               table_dtype=jnp.bfloat16):
    """Forward pass of WordCharEmbedding (concat=False, eval mode).

    X      : (B, S)     int32 word ids
    X_char : (B, S, C)  int32 char ids
    returns: (B, S, E)  float32
    """
    word_table = params["word_table"]      # (V, E), row 0 zero (padding_idx=0)
    char_table = params["char_table"]      # (Vc, Ec), row 0 zero
    w1, b1 = params["w1"], params["b1"]    # (K1*Ec, Co), (1, Co)
    w2, b2 = params["w2"], params["b2"]    # (K2*Ec, Co), (1, Co)
    k1, k2 = params["k1"], params["k2"]

    B, S = X.shape
    _, _, C = X_char.shape
    Vc, Ec = char_table.shape
    E = word_table.shape[1]
    Co = w1.shape[1]
    F = (k1 + k2) * Co
    N = B * S

    if C < max(k1, k2):
        raise ValueError(f"char length C={C} must be >= max kernel size "
                         f"{max(k1, k2)}")

    # Fold char_table into the conv weights (exact, in f32), then cast the
    # table once to bf16 for the MXU.  The one-hot operand stays exact.
    fused_tab = _fold_char_table(char_table, [w1, w2]).astype(table_dtype)
    b1 = b1.astype(jnp.float32)
    b2 = b2.astype(jnp.float32)

    # Tile selection: minimize N padding; keep >= 2 grid steps so the
    # "parallel" grid axis can feed both TensorCores on v7x.
    num_tiles = max(2, _cdiv(N, target_tile_n))
    tile_n = _round_up(_cdiv(N, num_tiles), 8)
    N_pad = tile_n * num_tiles

    X_flat = X.reshape(N).astype(jnp.int32)
    Xc_flat = X_char.reshape(N, C).astype(jnp.int32)
    if N_pad != N:
        # pad with id 0 -> zero embedding rows; padded outputs are sliced off.
        X_flat = jnp.pad(X_flat, (0, N_pad - N))
        Xc_flat = jnp.pad(Xc_flat, ((0, N_pad - N), (0, 0)))

    # Word-embedding gather stays in XLA (vocab may be large).
    word_vecs = jnp.take(word_table, X_flat, axis=0).astype(jnp.float32)

    grid = (num_tiles,)

    # VMEM budget derived from actual buffers (double-buffered streams, the
    # fused table, the position-major scratch and slop), capped for v7x.
    table_bytes = Vc * F * jnp.dtype(table_dtype).itemsize
    per_step = (2 * tile_n * C * 4          # char ids (double-buffered)
                + 2 * tile_n * E * 4        # word vecs
                + 2 * tile_n * E * 4        # output
                + 2 * table_bytes + 2 * 2 * Co * 4
                + C * tile_n * F * 4        # y scratch
                + tile_n * Vc * 8           # one-hot temporaries
                + 4 * tile_n * F * 4)       # combine temporaries / slop
    vmem_limit = int(min(64 * 1024 * 1024,
                         max(32 * 1024 * 1024, 2 * per_step)))

    # Advisory cost estimate for the XLA scheduler.
    flops = 2 * N_pad * C * Vc * F
    bytes_accessed = (N_pad * C * 4                 # char ids in
                      + 2 * N_pad * E * 4           # word vecs in + output
                      + int(table_bytes) + 2 * Co * 4 * 2)
    cost = pl.CostEstimate(flops=int(flops), transcendentals=0,
                           bytes_accessed=int(bytes_accessed))

    out = pl.pallas_call(
        functools.partial(_wordchar_kernel, k1=k1, k2=k2),
        out_shape=jax.ShapeDtypeStruct((N_pad, E), jnp.float32),
        grid_spec=pltpu.PrefetchScalarGridSpec(
            num_scalar_prefetch=0,
            grid=grid,
            in_specs=[
                pl.BlockSpec((tile_n, C), lambda i: (i, 0)),   # char ids
                pl.BlockSpec((tile_n, E), lambda i: (i, 0)),   # word vecs
                pl.BlockSpec((Vc, F), lambda i: (0, 0)),       # fused table
                pl.BlockSpec((1, Co), lambda i: (0, 0)),       # b1
                pl.BlockSpec((1, Co), lambda i: (0, 0)),       # b2
            ],
            out_specs=pl.BlockSpec((tile_n, E), lambda i: (i, 0)),
            scratch_shapes=[pltpu.VMEM((C * tile_n, F), jnp.float32)],
        ),
        compiler_params=pltpu.CompilerParams(
            dimension_semantics=("parallel",),
            vmem_limit_bytes=vmem_limit,
        ),
        cost_estimate=cost,
    )(Xc_flat, word_vecs, fused_tab, b1, b2)

    return out[:N].reshape(B, S, E)


# --------------------------- pure-JAX reference ----------------------------

def _reference_forward(X, X_char, params):
    word_table = params["word_table"]
    char_table = params["char_table"]
    w1, b1, w2, b2 = params["w1"], params["b1"], params["w2"], params["b2"]
    k1, k2 = params["k1"], params["k2"]

    B, S = X.shape
    C = X_char.shape[-1]
    Ec = char_table.shape[1]
    N = B * S

    word_vecs = jnp.take(word_table, X.reshape(N), axis=0)
    x = jnp.take(char_table, X_char.reshape(N * C), axis=0).reshape(N, C, Ec)

    def conv_branch(w, b, k):
        outs = []
        for t in range(C - k + 1):
            win = x[:, t:t + k, :].reshape(N, k * Ec)
            outs.append(jnp.maximum(win @ w + b, 0.0))
        return jnp.max(jnp.stack(outs, axis=0), axis=0)

    char_vec = jnp.concatenate([conv_branch(w1, b1, k1),
                                conv_branch(w2, b2, k2)], axis=1)
    return (char_vec + word_vecs).reshape(B, S, -1)


# --------------------------------- main ------------------------------------

if __name__ == "__main__":
    # Small, module-consistent shapes.
    B, S = 2, 8            # batch, sentence length
    C = 8                  # chars per word
    V, Vc = 100, 40        # word / char vocab sizes
    E = 32                 # word embedding size
    Ec = 16                # char embedding size
    Co = 16                # conv out_channels per kernel size
    K1, K2 = 2, 3          # kernel_sizes; char CNN output dim = 2*Co = E

    key = jax.random.PRNGKey(0)
    k_wt, k_ct, k_w1, k_b1, k_w2, k_b2, k_x, k_xc = jax.random.split(key, 8)

    # Deterministic parameter init (padding_idx=0 => zero row 0).
    word_table = 0.1 * jax.random.normal(k_wt, (V, E), jnp.float32)
    word_table = word_table.at[0].set(0.0)
    char_table = 0.1 * jax.random.normal(k_ct, (Vc, Ec), jnp.float32)
    char_table = char_table.at[0].set(0.0)

    # Conv2d(1, Co, (K, Ec)) weights, stored in im2col layout (K*Ec, Co).
    w1 = 0.1 * jax.random.normal(k_w1, (K1 * Ec, Co), jnp.float32)
    b1 = 0.1 * jax.random.normal(k_b1, (1, Co), jnp.float32)
    w2 = 0.1 * jax.random.normal(k_w2, (K2 * Ec, Co), jnp.float32)
    b2 = 0.1 * jax.random.normal(k_b2, (1, Co), jnp.float32)

    params = dict(word_table=word_table, char_table=char_table,
                  w1=w1, b1=b1, w2=w2, b2=b2, k1=K1, k2=K2)

    X = jax.random.randint(k_x, (B, S), 0, V, dtype=jnp.int32)
    X_char = jax.random.randint(k_xc, (B, S, C), 0, Vc, dtype=jnp.int32)

    out = wordchar_embedding_forward(X, X_char, params)
    out = jax.block_until_ready(out)

    ref = _reference_forward(X, X_char, params)
    assert out.shape == (B, S, E)
    # bf16 fused table on the char path -> ~1e-3 abs drift vs the f32 reference.
    assert jnp.allclose(out, ref, atol=1e-2, rtol=1e-2), "mismatch vs reference"

    print("KERNEL_OK")
</pallas_src>

<mosaic_0001>
module attributes {stable_mosaic.version = 11 : i64} {
  func.func @_wordchar_kernel(%arg0: i32, %arg1: memref<8x8xi32, #tpu.memory_space<vmem>>, %arg2: memref<8x32xf32, #tpu.memory_space<vmem>>, %arg3: memref<40x80xbf16, #tpu.memory_space<vmem>>, %arg4: memref<1x16xf32, #tpu.memory_space<vmem>>, %arg5: memref<1x16xf32, #tpu.memory_space<vmem>>, %arg6: memref<8x32xf32, #tpu.memory_space<vmem>>, %arg7: memref<64x80xf32, #tpu.memory_space<vmem>>) attributes {dimension_semantics = [#tpu.dimension_semantics<parallel>], iteration_bounds = array<i64: 2>, scalar_prefetch = 0 : i64, scratch_operands = 1 : i64, tpu.core_type = #tpu.core_type<tc>, window_params = [{transform_indices = @transform_0, window_bounds = array<i64: 8, 8>}, {transform_indices = @transform_1, window_bounds = array<i64: 8, 32>}, {pipeline_mode = #tpu.pipeline_mode<synchronous>, transform_indices = @transform_2, window_bounds = array<i64: 40, 80>}, {pipeline_mode = #tpu.pipeline_mode<synchronous>, transform_indices = @transform_3, window_bounds = array<i64: 1, 16>}, {pipeline_mode = #tpu.pipeline_mode<synchronous>, transform_indices = @transform_4, window_bounds = array<i64: 1, 16>}, {transform_indices = @transform_5, window_bounds = array<i64: 8, 32>}]} {
    %c0 = arith.constant 0 : index
    %c0_0 = arith.constant 0 : index
    %0 = vector.load %arg1[%c0, %c0_0] : memref<8x8xi32, #tpu.memory_space<vmem>>, vector<8x8xi32>
    %c0_1 = arith.constant 0 : index
    %c0_2 = arith.constant 0 : index
    %1 = vector.load %arg3[%c0_1, %c0_2] : memref<40x80xbf16, #tpu.memory_space<vmem>>, vector<40x80xbf16>
    %2 = tpu.iota {dimensions = array<i32: 1>} : vector<8x40xi32>
    %3 = vector.extract_strided_slice %0 {offsets = [0, 0], sizes = [8, 1], strides = [1, 1]} : vector<8x8xi32> to vector<8x1xi32>
    %4 = vector.broadcast %3 : vector<8x1xi32> to vector<8x40xi32>
    %5 = arith.cmpi eq, %4, %2 : vector<8x40xi32>
    %6 = arith.extui %5 : vector<8x40xi1> to vector<8x40xi32>
    %7 = arith.sitofp %6 : vector<8x40xi32> to vector<8x40xf32>
    %8 = arith.truncf %7 : vector<8x40xf32> to vector<8x40xbf16>
    %cst = arith.constant dense<0.000000e+00> : vector<8x80xf32>
    %9 = tpu.matmul %8, %1, %cst {dimension_numbers = #tpu.dot_dimension_numbers<[1], [0], [0], [1], [0, 0, 1, 1], [], []>} : vector<8x40xbf16>, vector<40x80xbf16>, vector<8x80xf32> -> vector<8x80xf32>
    %c0_3 = arith.constant 0 : index
    %c0_4 = arith.constant 0 : index
    %10 = vector.load %arg7[%c0_3, %c0_4] : memref<64x80xf32, #tpu.memory_space<vmem>>, vector<8x80xf32>
    tpu.vector_store %arg7[%c0_3, %c0_4], %9 {strides = array<i32>} : memref<64x80xf32, #tpu.memory_space<vmem>>, vector<8x80xf32>,
    %11 = vector.extract_strided_slice %0 {offsets = [0, 1], sizes = [8, 1], strides = [1, 1]} : vector<8x8xi32> to vector<8x1xi32>
    %12 = vector.broadcast %11 : vector<8x1xi32> to vector<8x40xi32>
    %13 = arith.cmpi eq, %12, %2 : vector<8x40xi32>
    %14 = arith.extui %13 : vector<8x40xi1> to vector<8x40xi32>
    %15 = arith.sitofp %14 : vector<8x40xi32> to vector<8x40xf32>
    %16 = arith.truncf %15 : vector<8x40xf32> to vector<8x40xbf16>
    %cst_5 = arith.constant dense<0.000000e+00> : vector<8x80xf32>
    %17 = tpu.matmul %16, %1, %cst_5 {dimension_numbers = #tpu.dot_dimension_numbers<[1], [0], [0], [1], [0, 0, 1, 1], [], []>} : vector<8x40xbf16>, vector<40x80xbf16>, vector<8x80xf32> -> vector<8x80xf32>
    %c8 = arith.constant 8 : index
    %c0_6 = arith.constant 0 : index
    %18 = vector.load %arg7[%c8, %c0_6] : memref<64x80xf32, #tpu.memory_space<vmem>>, vector<8x80xf32>
    tpu.vector_store %arg7[%c8, %c0_6], %17 {strides = array<i32>} : memref<64x80xf32, #tpu.memory_space<vmem>>, vector<8x80xf32>,
    %19 = vector.extract_strided_slice %0 {offsets = [0, 2], sizes = [8, 1], strides = [1, 1]} : vector<8x8xi32> to vector<8x1xi32>
    %20 = vector.broadcast %19 : vector<8x1xi32> to vector<8x40xi32>
    %21 = arith.cmpi eq, %20, %2 : vector<8x40xi32>
    %22 = arith.extui %21 : vector<8x40xi1> to vector<8x40xi32>
    %23 = arith.sitofp %22 : vector<8x40xi32> to vector<8x40xf32>
    %24 = arith.truncf %23 : vector<8x40xf32> to vector<8x40xbf16>
    %cst_7 = arith.constant dense<0.000000e+00> : vector<8x80xf32>
    %25 = tpu.matmul %24, %1, %cst_7 {dimension_numbers = #tpu.dot_dimension_numbers<[1], [0], [0], [1], [0, 0, 1, 1], [], []>} : vector<8x40xbf16>, vector<40x80xbf16>, vector<8x80xf32> -> vector<8x80xf32>
    %c16 = arith.constant 16 : index
    %c0_8 = arith.constant 0 : index
    %26 = vector.load %arg7[%c16, %c0_8] : memref<64x80xf32, #tpu.memory_space<vmem>>, vector<8x80xf32>
    tpu.vector_store %arg7[%c16, %c0_8], %25 {strides = array<i32>} : memref<64x80xf32, #tpu.memory_space<vmem>>, vector<8x80xf32>,
    %27 = vector.extract_strided_slice %0 {offsets = [0, 3], sizes = [8, 1], strides = [1, 1]} : vector<8x8xi32> to vector<8x1xi32>
    %28 = vector.broadcast %27 : vector<8x1xi32> to vector<8x40xi32>
    %29 = arith.cmpi eq, %28, %2 : vector<8x40xi32>
    %30 = arith.extui %29 : vector<8x40xi1> to vector<8x40xi32>
    %31 = arith.sitofp %30 : vector<8x40xi32> to vector<8x40xf32>
    %32 = arith.truncf %31 : vector<8x40xf32> to vector<8x40xbf16>
    %cst_9 = arith.constant dense<0.000000e+00> : vector<8x80xf32>
    %33 = tpu.matmul %32, %1, %cst_9 {dimension_numbers = #tpu.dot_dimension_numbers<[1], [0], [0], [1], [0, 0, 1, 1], [], []>} : vector<8x40xbf16>, vector<40x80xbf16>, vector<8x80xf32> -> vector<8x80xf32>
    %c24 = arith.constant 24 : index
    %c0_10 = arith.constant 0 : index
    %34 = vector.load %arg7[%c24, %c0_10] : memref<64x80xf32, #tpu.memory_space<vmem>>, vector<8x80xf32>
    tpu.vector_store %arg7[%c24, %c0_10], %33 {strides = array<i32>} : memref<64x80xf32, #tpu.memory_space<vmem>>, vector<8x80xf32>,
    %35 = vector.extract_strided_slice %0 {offsets = [0, 4], sizes = [8, 1], strides = [1, 1]} : vector<8x8xi32> to vector<8x1xi32>
    %36 = vector.broadcast %35 : vector<8x1xi32> to vector<8x40xi32>
    %37 = arith.cmpi eq, %36, %2 : vector<8x40xi32>
    %38 = arith.extui %37 : vector<8x40xi1> to vector<8x40xi32>
    %39 = arith.sitofp %38 : vector<8x40xi32> to vector<8x40xf32>
    %40 = arith.truncf %39 : vector<8x40xf32> to vector<8x40xbf16>
    %cst_11 = arith.constant dense<0.000000e+00> : vector<8x80xf32>
    %41 = tpu.matmul %40, %1, %cst_11 {dimension_numbers = #tpu.dot_dimension_numbers<[1], [0], [0], [1], [0, 0, 1, 1], [], []>} : vector<8x40xbf16>, vector<40x80xbf16>, vector<8x80xf32> -> vector<8x80xf32>
    %c32 = arith.constant 32 : index
    %c0_12 = arith.constant 0 : index
    %42 = vector.load %arg7[%c32, %c0_12] : memref<64x80xf32, #tpu.memory_space<vmem>>, vector<8x80xf32>
    tpu.vector_store %arg7[%c32, %c0_12], %41 {strides = array<i32>} : memref<64x80xf32, #tpu.memory_space<vmem>>, vector<8x80xf32>,
    %43 = vector.extract_strided_slice %0 {offsets = [0, 5], sizes = [8, 1], strides = [1, 1]} : vector<8x8xi32> to vector<8x1xi32>
    %44 = vector.broadcast %43 : vector<8x1xi32> to vector<8x40xi32>
    %45 = arith.cmpi eq, %44, %2 : vector<8x40xi32>
    %46 = arith.extui %45 : vector<8x40xi1> to vector<8x40xi32>
    %47 = arith.sitofp %46 : vector<8x40xi32> to vector<8x40xf32>
    %48 = arith.truncf %47 : vector<8x40xf32> to vector<8x40xbf16>
    %cst_13 = arith.constant dense<0.000000e+00> : vector<8x80xf32>
    %49 = tpu.matmul %48, %1, %cst_13 {dimension_numbers = #tpu.dot_dimension_numbers<[1], [0], [0], [1], [0, 0, 1, 1], [], []>} : vector<8x40xbf16>, vector<40x80xbf16>, vector<8x80xf32> -> vector<8x80xf32>
    %c40 = arith.constant 40 : index
    %c0_14 = arith.constant 0 : index
    %50 = vector.load %arg7[%c40, %c0_14] : memref<64x80xf32, #tpu.memory_space<vmem>>, vector<8x80xf32>
    tpu.vector_store %arg7[%c40, %c0_14], %49 {strides = array<i32>} : memref<64x80xf32, #tpu.memory_space<vmem>>, vector<8x80xf32>,
    %51 = vector.extract_strided_slice %0 {offsets = [0, 6], sizes = [8, 1], strides = [1, 1]} : vector<8x8xi32> to vector<8x1xi32>
    %52 = vector.broadcast %51 : vector<8x1xi32> to vector<8x40xi32>
    %53 = arith.cmpi eq, %52, %2 : vector<8x40xi32>
    %54 = arith.extui %53 : vector<8x40xi1> to vector<8x40xi32>
    %55 = arith.sitofp %54 : vector<8x40xi32> to vector<8x40xf32>
    %56 = arith.truncf %55 : vector<8x40xf32> to vector<8x40xbf16>
    %cst_15 = arith.constant dense<0.000000e+00> : vector<8x80xf32>
    %57 = tpu.matmul %56, %1, %cst_15 {dimension_numbers = #tpu.dot_dimension_numbers<[1], [0], [0], [1], [0, 0, 1, 1], [], []>} : vector<8x40xbf16>, vector<40x80xbf16>, vector<8x80xf32> -> vector<8x80xf32>
    %c48 = arith.constant 48 : index
    %c0_16 = arith.constant 0 : index
    %58 = vector.load %arg7[%c48, %c0_16] : memref<64x80xf32, #tpu.memory_space<vmem>>, vector<8x80xf32>
    tpu.vector_store %arg7[%c48, %c0_16], %57 {strides = array<i32>} : memref<64x80xf32, #tpu.memory_space<vmem>>, vector<8x80xf32>,
    %59 = vector.extract_strided_slice %0 {offsets = [0, 7], sizes = [8, 1], strides = [1, 1]} : vector<8x8xi32> to vector<8x1xi32>
    %60 = vector.broadcast %59 : vector<8x1xi32> to vector<8x40xi32>
    %61 = arith.cmpi eq, %60, %2 : vector<8x40xi32>
    %62 = arith.extui %61 : vector<8x40xi1> to vector<8x40xi32>
    %63 = arith.sitofp %62 : vector<8x40xi32> to vector<8x40xf32>
    %64 = arith.truncf %63 : vector<8x40xf32> to vector<8x40xbf16>
    %cst_17 = arith.constant dense<0.000000e+00> : vector<8x80xf32>
    %65 = tpu.matmul %64, %1, %cst_17 {dimension_numbers = #tpu.dot_dimension_numbers<[1], [0], [0], [1], [0, 0, 1, 1], [], []>} : vector<8x40xbf16>, vector<40x80xbf16>, vector<8x80xf32> -> vector<8x80xf32>
    %c56 = arith.constant 56 : index
    %c0_18 = arith.constant 0 : index
    %66 = vector.load %arg7[%c56, %c0_18] : memref<64x80xf32, #tpu.memory_space<vmem>>, vector<8x80xf32>
    tpu.vector_store %arg7[%c56, %c0_18], %65 {strides = array<i32>} : memref<64x80xf32, #tpu.memory_space<vmem>>, vector<8x80xf32>,
    %c0_19 = arith.constant 0 : index
    %c0_20 = arith.constant 0 : index
    %67 = vector.load %arg7[%c0_19, %c0_20] : memref<64x80xf32, #tpu.memory_space<vmem>>, vector<56x16xf32>
    %c8_21 = arith.constant 8 : index
    %c16_22 = arith.constant 16 : index
    %68 = vector.load %arg7[%c8_21, %c16_22] : memref<64x80xf32, #tpu.memory_space<vmem>>, vector<56x16xf32>
    %69 = arith.addf %67, %68 : vector<56x16xf32>
    %70 = vector.extract_strided_slice %69 {offsets = [0, 0], sizes = [8, 16], strides = [1, 1]} : vector<56x16xf32> to vector<8x16xf32>
    %71 = vector.extract_strided_slice %69 {offsets = [8, 0], sizes = [8, 16], strides = [1, 1]} : vector<56x16xf32> to vector<8x16xf32>
    %72 = arith.maximumf %70, %71 : vector<8x16xf32>
    %73 = vector.extract_strided_slice %69 {offsets = [16, 0], sizes = [8, 16], strides = [1, 1]} : vector<56x16xf32> to vector<8x16xf32>
    %74 = arith.maximumf %72, %73 : vector<8x16xf32>
    %75 = vector.extract_strided_slice %69 {offsets = [24, 0], sizes = [8, 16], strides = [1, 1]} : vector<56x16xf32> to vector<8x16xf32>
    %76 = arith.maximumf %74, %75 : vector<8x16xf32>
    %77 = vector.extract_strided_slice %69 {offsets = [32, 0], sizes = [8, 16], strides = [1, 1]} : vector<56x16xf32> to vector<8x16xf32>
    %78 = arith.maximumf %76, %77 : vector<8x16xf32>
    %79 = vector.extract_strided_slice %69 {offsets = [40, 0], sizes = [8, 16], strides = [1, 1]} : vector<56x16xf32> to vector<8x16xf32>
    %80 = arith.maximumf %78, %79 : vector<8x16xf32>
    %81 = vector.extract_strided_slice %69 {offsets = [48, 0], sizes = [8, 16], strides = [1, 1]} : vector<56x16xf32> to vector<8x16xf32>
    %82 = arith.maximumf %80, %81 : vector<8x16xf32>
    %c0_23 = arith.constant 0 : index
    %c0_24 = arith.constant 0 : index
    %83 = vector.load %arg4[%c0_23, %c0_24] : memref<1x16xf32, #tpu.memory_space<vmem>>, vector<1x16xf32>
    %84 = vector.broadcast %83 : vector<1x16xf32> to vector<8x16xf32>
    %85 = arith.addf %82, %84 : vector<8x16xf32>
    %cst_25 = arith.constant 0.000000e+00 : f32
    %86 = vector.broadcast %cst_25 : f32 to vector<8x16xf32>
    %87 = arith.maximumf %85, %86 : vector<8x16xf32>
    %c0_26 = arith.constant 0 : index
    %c32_27 = arith.constant 32 : index
    %88 = vector.load %arg7[%c0_26, %c32_27] : memref<64x80xf32, #tpu.memory_space<vmem>>, vector<48x16xf32>
    %c8_28 = arith.constant 8 : index
    %c48_29 = arith.constant 48 : index
    %89 = vector.load %arg7[%c8_28, %c48_29] : memref<64x80xf32, #tpu.memory_space<vmem>>, vector<48x16xf32>
    %90 = arith.addf %88, %89 : vector<48x16xf32>
    %c16_30 = arith.constant 16 : index
    %c64 = arith.constant 64 : index
    %91 = vector.load %arg7[%c16_30, %c64] : memref<64x80xf32, #tpu.memory_space<vmem>>, vector<48x16xf32>
    %92 = arith.addf %90, %91 : vector<48x16xf32>
    %93 = vector.extract_strided_slice %92 {offsets = [0, 0], sizes = [8, 16], strides = [1, 1]} : vector<48x16xf32> to vector<8x16xf32>
    %94 = vector.extract_strided_slice %92 {offsets = [8, 0], sizes = [8, 16], strides = [1, 1]} : vector<48x16xf32> to vector<8x16xf32>
    %95 = arith.maximumf %93, %94 : vector<8x16xf32>
    %96 = vector.extract_strided_slice %92 {offsets = [16, 0], sizes = [8, 16], strides = [1, 1]} : vector<48x16xf32> to vector<8x16xf32>
    %97 = arith.maximumf %95, %96 : vector<8x16xf32>
    %98 = vector.extract_strided_slice %92 {offsets = [24, 0], sizes = [8, 16], strides = [1, 1]} : vector<48x16xf32> to vector<8x16xf32>
    %99 = arith.maximumf %97, %98 : vector<8x16xf32>
    %100 = vector.extract_strided_slice %92 {offsets = [32, 0], sizes = [8, 16], strides = [1, 1]} : vector<48x16xf32> to vector<8x16xf32>
    %101 = arith.maximumf %99, %100 : vector<8x16xf32>
    %102 = vector.extract_strided_slice %92 {offsets = [40, 0], sizes = [8, 16], strides = [1, 1]} : vector<48x16xf32> to vector<8x16xf32>
    %103 = arith.maximumf %101, %102 : vector<8x16xf32>
    %c0_31 = arith.constant 0 : index
    %c0_32 = arith.constant 0 : index
    %104 = vector.load %arg5[%c0_31, %c0_32] : memref<1x16xf32, #tpu.memory_space<vmem>>, vector<1x16xf32>
    %105 = vector.broadcast %104 : vector<1x16xf32> to vector<8x16xf32>
    %106 = arith.addf %103, %105 : vector<8x16xf32>
    %cst_33 = arith.constant 0.000000e+00 : f32
    %107 = vector.broadcast %cst_33 : f32 to vector<8x16xf32>
    %108 = arith.maximumf %106, %107 : vector<8x16xf32>
    %109 = tpu.concatenate %87, %108 in 1 : vector<8x16xf32>, vector<8x16xf32> -> vector<8x32xf32>
    %c0_34 = arith.constant 0 : index
    %c0_35 = arith.constant 0 : index
    %110 = vector.load %arg2[%c0_34, %c0_35] : memref<8x32xf32, #tpu.memory_space<vmem>>, vector<8x32xf32>
    %111 = arith.addf %109, %110 : vector<8x32xf32>
    %c0_36 = arith.constant 0 : index
    %c0_37 = arith.constant 0 : index
    %112 = vector.load %arg6[%c0_36, %c0_37] : memref<8x32xf32, #tpu.memory_space<vmem>>, vector<8x32xf32>
    tpu.vector_store %arg6[%c0_36, %c0_37], %111 {strides = array<i32>} : memref<8x32xf32, #tpu.memory_space<vmem>>, vector<8x32xf32>,
    return
  }
  func.func @transform_0(%arg0: i32) -> (i32, i32) {
    %c0_i32 = arith.constant 0 : i32
    %c0_i32_0 = arith.constant 0 : i32
    return %arg0, %c0_i32 : i32, i32
  }
  func.func @transform_1(%arg0: i32) -> (i32, i32) {
    %c0_i32 = arith.constant 0 : i32
    %c0_i32_0 = arith.constant 0 : i32
    return %arg0, %c0_i32 : i32, i32
  }
  func.func @transform_2(%arg0: i32) -> (i32, i32) {
    %c0_i32 = arith.constant 0 : i32
    %c0_i32_0 = arith.constant 0 : i32
    %c0_i32_1 = arith.constant 0 : i32
    return %c0_i32, %c0_i32_0 : i32, i32
  }
  func.func @transform_3(%arg0: i32) -> (i32, i32) {
    %c0_i32 = arith.constant 0 : i32
    %c0_i32_0 = arith.constant 0 : i32
    %c0_i32_1 = arith.constant 0 : i32
    return %c0_i32, %c0_i32_0 : i32, i32
  }
  func.func @transform_4(%arg0: i32) -> (i32, i32) {
    %c0_i32 = arith.constant 0 : i32
    %c0_i32_0 = arith.constant 0 : i32
    %c0_i32_1 = arith.constant 0 : i32
    return %c0_i32, %c0_i32_0 : i32, i32
  }
  func.func @transform_5(%arg0: i32) -> (i32, i32) {
    %c0_i32 = arith.constant 0 : i32
    %c0_i32_0 = arith.constant 0 : i32
    return %arg0, %c0_i32 : i32, i32
  }
}

</mosaic_0001>

<bundles_post_ra>
// kernel: tpu_custom_call.1
= control target key start
LH: loop header
LB: loop body
LE: loop exit
PB: predicated region body
PF: predicated region fallthrough
CT: control target
= control target key end

     0   :  { %10 = vsyncpa [#allocation4], 0  ;;  %s1541_s0 = inlined_call_operand.vmem [shape: s32[16,8], index: 0, kind: input, shape index: {}]   ;;  %s1542_s1 = inlined_call_operand.hbm [shape: f32[16,32], index: 1, kind: input, shape index: {}]   ;;  %s1543_s2 = inlined_call_operand.vmem [shape: bf16[40,80], index: 2, kind: input, shape index: {}]   ;;  %s1544_s3 = inlined_call_operand.vmem [shape: f32[1,16], index: 3, kind: input, shape index: {}]   ;;  %s1545_s4 = inlined_call_operand.vmem [shape: f32[1,16], index: 4, kind: input, shape index: {}]   ;;  %s1546_s5 = inlined_call_operand.hbm [shape: f32[16,32], index: 5, kind: output, shape index: {}]  }
   0x1   :  { %12 = vsyncpa [#allocation4 + $0x1], 0 }
   0x2   :  { %13 = vsyncpa [#allocation5], 0 }
   0x3   :  { %15 = vsyncpa [#allocation5 + $0x1], 0  ;;  %s1255_s18 = smov 0   ;;  %s1257_s19 = smov 0  }
   0x4   :  { %s1259_s20 = smov 0   ;;  %s1261_s21 = smov 0  }
   0x5 LB: > { %s1276_s22 = sadd.s32 4294967295, %s1208_s21   ;;  %s899_s23 = sadd.s32 4294967294, %s1208_s21   ;;  %s1208_s21 = sphi %s1261_s21, %s1563_s21   ;;  %s1204_s20 = sphi %s1259_s20, %s1562_s20   ;;  %s1200_s19 = sphi %s1257_s19, %s1561_s19   ;;  %s1196_s18 = sphi %s1255_s18, %s1560_s18  }
   0x6   : > { %s1280_s24 = sadd.s32 1, %s1208_s21   ;;  %s54_s25 = sadd.s32 1, %s1204_s20 }
   0x7   : > { %s51_s26 = ssub.s32 %s1208_s21, %s1280_s24  ;;  %p61_p0 = scmp.ne.s32.totalorder %s1204_s20, %s1200_s19 }
   0x8   : > { %p52_p1 = scmp.eq.s32.totalorder %s51_s26, 0  ;;  %p62_p2 = scmp.eq.s32.totalorder %s1208_s21, 0 }
   0x9   : > { %p67_p3 = scmp.ne.s32.totalorder %s1200_s19, %s1196_s18  ;;  %p68_p4 = scmp.eq.s32.totalorder %s1276_s22, 0 }
   0xa   : > { %s1292_s27 = scalar_select %p52_p1, %s1204_s20, %s54_s25  }
   0xb   : > { %p1294_p5 = por %p62_p2, %p61_p0  ;;  %p1298_p6 = por %p68_p4, %p67_p3 }
   0xc   : > { %p154_p7 = scmp.eq.s32.totalorder %s1276_s22, 1  ;;  %p160_p8 = scmp.eq.s32.totalorder %s899_s23, 1 }
   0xd   : > { %s1550_s29 = scalar_select %p1298_p6, 1, 0 }
   0xe   : > { %p1057_p10 = scmp.lt.s32.totalorder %s1208_s21, 2  ;;  %p1305_p11 = por %p154_p7, %p61_p0 }
   0xf   : > { %p1309_p12 = por %p160_p8, %p67_p3  ;;  %s196_s7 = sand.u32 1, %s1204_s20  }
  0x10   : > { %s1551_s30 = scalar_select %p1305_p11, 1, 0 }
  0x11   : > { %s1552_s6 = scalar_select %p1309_p12, 1, 0 }
  0x12   : > { %s903_s8 = sshll.u32 %s1208_s21, 7  ;;  %s902_s9 = sshll.u32 %s196_s7, 3 }
  0x13   : > { %s1318_s12 = scalar_lea.hbm %s1542_s1, %s903_s8  ;;  %s200_s13 = scalar_lea.vmem [#allocation3], %s902_s9 }
  0x14   : > { %s207_s14 = sshll.u32 %s200_s13, 4  ;;  %p1322_p13 = pnand %p1057_p10, %p1294_p5  ;;  %s1326_s14 = int_to_ptr.vmem [resolvable:$true] %s207_s14 }
  0x15   : > { %s197_s16 = scalar_lea.sflag [#allocation4], %s196_s7  ;;  %s1116_s17 = scalar_lea.hbm %s1318_s12, 128 }
  0x16   : > { %p1117_p2 = scmp.ne.s32.totalorder %s1318_s12, %s1116_s17  ;;  %p1118_p3 = pneg %p1322_p13 }
  0x17   : > { %s1121_s26 = scalar_lea.hbm %s1542_s1, 256  ;;  %p1122_p5 = scmp.lt.s32.totalorder %s1318_s12, %s1542_s1 }
  0x18   : > { %p1119_p4 = pnand %p1118_p3, %p1117_p2  ;;  %p1123_p8 = scmp.lt.s32.totalorder %s1121_s26, %s1116_s17 }
  0x1a   : > { %p1120_p7 = pneg %p1119_p4  ;;  %p1124_p10 = por %p1123_p8, %p1122_p5 }
  0x1c   : > { %p1125_p9 = pnand %p1124_p10, %p1120_p7 }
  0x1e   : > { %1128 = shalt.err (!%p1125_p9)
}
  0x1f   : > { %s1129_s7 = scalar_lea.vmem %s1326_s14, 128  ;;  %s1210_s9 = smov [#allocation3]  }
  0x20   : > { %p1130_p0 = scmp.ne.s32.totalorder %s1326_s14, %s1129_s7  ;;  %s1134_s10 = sshll.u32 %s1210_s9, 4  ;;  %s1135_s10 = int_to_ptr.vmem [resolvable:$false] %s1134_s10 }
  0x21   : > { %s1136_s11 = scalar_lea.vmem %s1135_s10, 256  ;;  %p1137_p4 = scmp.lt.s32.totalorder %s1326_s14, %s1135_s10 }
  0x22   : > { %p1132_p1 = pnand %p1130_p0, %p1118_p3  ;;  %p1138_p12 = scmp.lt.s32.totalorder %s1136_s11, %s1129_s7 }
  0x24   : > { %p1133_p2 = pneg %p1132_p1  ;;  %p1139_p11 = por %p1138_p12, %p1137_p4 }
  0x26   : > { %p1140_p6 = pnand %p1139_p11, %p1133_p2 }
  0x28   : > { %1143 = shalt.err (!%p1140_p6)
}
  0x29   : > { %1052 = dma.hbm_to_vmem [thread:$0]  (!%p1322_p13), %s1318_s12, 128, %s1326_s14, %s197_s16  }
  0x2a   : > { %p1554_p9 = scmp.lt.s32.totalorder %s1208_s21, 3  ;;  %p1555_p7 = scmp.ge.s32.totalorder %s1208_s21, 1 }
  0x2c   : > { %p213_p0 = pnand %p1555_p7, %p1554_p9 }
  0x2d   : > { %s1353_s13 = sand.u32 (!%p213_p0), 1, %s1200_s19   ;;  %p1556_p6 = scmp.ne.s32.totalorder (!%p213_p0), %s1550_s29, 0 }
  0x2e   : > { %216 = sbr.rel (%p213_p0) target bundleno = 683 (0x2ab), region = 40  ;;  %s905_s17 = sshll.u32 (!%p213_p0), %s1353_s13, 3 }
  0x2f   : > { %s219_s23 = scalar_lea.sflag (!%p213_p0), [#allocation4], %s1353_s13  ;;  %s1359_s15 = scalar_lea.vmem (!%p213_p0), [#allocation3], %s905_s17 }
  0x33   : > { %1187 = dma.done.wait (%p1556_p6), %s219_s23, 128  }
  0x34   : > { %1189 = vsyncadd (%p1556_p6), %s219_s23, 4294967168  ;;  %p253_p11 = scmp.lt.s32.totalorder %s1276_s22, 1  ;;  %v1211_v0 = vmov 0   ;;  %v1212_v1 = vmov 2   ;;  %v1213_v2 = vmov 0.0   ;;  %vm292_vm0 = vcmask 1043456  }
  0x35   : > { %1104 = vset.pattern.permute.xlu0 %v1211_v0  ;;  %1106 = vset.pattern.permute.xlu1 %v1212_v1  ;;  %v1113_v4 = vld [vmem:[%s1543_s2 + $0x10] ss:$0 sps:$4 sm:$0xff]   ;;  %vm1214_vm1 = vmmov 0   ;;  %v1385_v6 = vld [vmem:[%s1543_s2 + $0x8] sm:$0xff]   ;;  %v1215_v7 = vmov 1   ;;  %v1216_v8 = vmov 3   ;;  %v264_v14 = vlaneseq }
  0x36   : > { %s254_s12 = scalar_select %p253_p11, %s1276_s22, 1  ;;  %965 = vmatprep.subr.bf16.mxu0 %v1213_v2  ;;  %975 = vmatprep.subr.bf16.mxu1 %v1213_v2  ;;  %v1379_v5 = vsel %vm292_vm0, %v1113_v4, 0  ;;  %v1396_v9 = vld [vmem:[%s1543_s2] sm:$0xff]   ;;  %v1217_v10 = vmov 4   ;;  %v1218_v11 = vmov 5   ;;  %v1219_v12 = vmov 6  }
  0x37   : > { %971 = vmatprep.mubr.msk.bf16.mxu0 %vm1214_vm1, %v1213_v2  ;;  %981 = vmatprep.mubr.msk.bf16.mxu1 %vm1214_vm1, %v1213_v2  ;;  %v1220_v13 = vmov 7   ;;  %v1403_v15 = vand.u32 127, %v264_v14  ;;  %vm288_vm3 = vcmask 326656   ;;  %vm336_vm11 = vcmask 654336   ;;  %s1221_s11 = smov 112   ;;  %s1222_s23 = smov 96  }
  0x38   : > { %s907_s14 = sshll.u32 %s254_s12, 3  ;;  %966 = vmatpush3.bf16.msra.mxu0 %v1379_v5  ;;  %976 = vmatpush3.bf16.msra.mxu1 %v1379_v5  ;;  %s1223_s16 = smov 32   ;;  %vm797_vm12 = vcmask 130048   ;;  %vm801_vm13 = vcmask 261120  }
  0x39   : > { %s256_s26 = scalar_lea.vmem %s1541_s0, %s907_s14  ;;  %967 = vmatprep.subr.bf16.mxu0 %v1213_v2  ;;  %977 = vmatprep.subr.bf16.mxu1 %v1213_v2  ;;  %s930_s29 = sshll.u32 %s1276_s22, 7 }
  0x3a   : > { %v258_v3 = vld [vmem:[%s256_s26] sm:$0xff]  ;;  %s252_s28 = scalar_lea.vmem [#allocation6], %s905_s17  ;;  %s815_s10 = scalar_lea.hbm %s1546_s5, %s930_s29 }
  0x3b   : > { %267 = vperm.xlu0 %1104, %v258_v3   ;;  %390 = vperm.xlu1 %1106, %v258_v3   ;;  %s817_s8 = sshll.u32 %s252_s28, 4  ;;  %p1557_p13 = scmp.ne.s32.totalorder %s1551_s30, 0  ;;  %s818_s8 = int_to_ptr.vmem [resolvable:$true] %s817_s8 }
  0x3c   : > { %968 = vmatpush3.bf16.msra.mxu0 %v1385_v6  ;;  %978 = vmatpush3.bf16.msra.mxu1 %v1385_v6  ;;  %s1224_s22 = smov [#allocation6]  }
  0x3d   : > { %969 = vmatprep.subr.bf16.mxu0 %v1213_v2  ;;  %979 = vmatprep.subr.bf16.mxu1 %v1213_v2 }
  0x3f   : > { %1105 = vset.pattern.permute.xlu0 %v1215_v7  ;;  %1107 = vset.pattern.permute.xlu1 %v1216_v8 }
  0x40   : > { %339 = vperm.xlu0 %1105, %v258_v3   ;;  %441 = vperm.xlu1 %1107, %v258_v3  }
  0x41   : > { %970 = vmatpush3.bf16.msra.mxu0 %v1396_v9  ;;  %980 = vmatpush3.bf16.msra.mxu1 %v1396_v9 }
  0x42   : > { %985 = vmatprep.subr.bf16.mxu0 %v1213_v2  ;;  %995 = vmatprep.subr.bf16.mxu1 %v1213_v2 }
  0x44   : > { %1108 = vset.pattern.permute.xlu1 %v1217_v10  ;;  %1109 = vset.pattern.permute.xlu0 %v1218_v11 }
  0x45   : > { %492 = vperm.xlu1 %1108, %v258_v3   ;;  %543 = vperm.xlu0 %1109, %v258_v3  }
  0x49   : > { %1110 = vset.pattern.permute.xlu1 %v1219_v12  ;;  %1112 = vset.pattern.permute.xlu0 %v1220_v13 }
  0x4a   : > { %594 = vperm.xlu1 %1110, %v258_v3  }
  0x4e   : > { %1111 = vset.pattern.permute.xlu1 %v1220_v13  ;;  %v928_v13 = vld [vmem:[%s1545_s4] ss:$0 sm:$0xff] }
  0x4f   : > { %645 = vperm.xlu1 %1111, %v258_v3  }
  0xb6   : > { %v268_v16 = vpop.permute.xlu0 %267  ;;  %v391_v19 = vpop.permute.xlu1 %390 }
  0xb7   : > { %vm269_vm2 = vcmp.eq.s32.totalorder %v268_v16, %v1403_v15  ;;  %vm392_vm5 = vcmp.eq.s32.totalorder %v391_v19, %v1403_v15 }
  0xb8   : > { %v908_v17 = vsel %vm269_vm2, 1.0, %v1213_v2  ;;  %v915_v24 = vsel %vm392_vm5, 1.0, %v1213_v2 }
  0xb9   : > { %v272_v18 = vpack.c.bf16 %v908_v17, %v908_v17  ;;  %v395_v25 = vpack.c.bf16 %v915_v24, %v915_v24 }
  0xbb   : > { %972 = vmatmul.mubr.msk.bf16.vlgmr.msra.gmra.mxu0 %vm288_vm3, %v272_v18  ;;  %v340_v20 = vpop.permute.xlu0 %339  ;;  %v442_v23 = vpop.permute.xlu1 %441 }
  0xbc   : > { %986 = vmatpush3.bf16.msra.mxu0 %v1379_v5  ;;  %vm341_vm4 = vcmp.eq.s32.totalorder %v340_v20, %v1403_v15  ;;  %991 = vmatprep.mubr.msk.bf16.mxu0 %vm1214_vm1, %v1213_v2  ;;  %vm443_vm6 = vcmp.eq.s32.totalorder %v442_v23, %v1403_v15 }
  0xbd   : > { %v913_v21 = vsel %vm341_vm4, 1.0, %v1213_v2  ;;  %987 = vmatprep.subr.bf16.mxu0 %v1213_v2  ;;  %v917_v26 = vsel %vm443_vm6, 1.0, %v1213_v2 }
  0xbe   : > { %v344_v22 = vpack.c.bf16 %v913_v21, %v913_v21  ;;  %v446_v28 = vpack.c.bf16 %v917_v26, %v917_v26 }
  0xc0   : > { %988 = vmatpush3.bf16.msra.mxu0 %v1385_v6  ;;  %982 = vmatmul.mubr.msk.bf16.vlgmr.msra.gmra.mxu1 %vm288_vm3, %v344_v22  ;;  %v493_v27 = vpop.permute.xlu1 %492  ;;  %v544_v29 = vpop.permute.xlu0 %543 }
  0xc1   : > { %996 = vmatpush3.bf16.msra.mxu1 %v1379_v5  ;;  %989 = vmatprep.subr.bf16.mxu0 %v1213_v2  ;;  %vm494_vm7 = vcmp.eq.s32.totalorder %v493_v27, %v1403_v15  ;;  %vm545_vm8 = vcmp.eq.s32.totalorder %v544_v29, %v1403_v15 }
  0xc2   : > { %997 = vmatprep.subr.bf16.mxu1 %v1213_v2  ;;  %1001 = vmatprep.mubr.msk.bf16.mxu1 %vm1214_vm1, %v1213_v2  ;;  %v919_v30 = vsel %vm494_vm7, 1.0, %v1213_v2  ;;  %v921_v32 = vsel %vm545_vm8, 1.0, %v1213_v2 }
  0xc3   : > { %v497_v31 = vpack.c.bf16 %v919_v30, %v919_v30  ;;  %v548_v34 = vpack.c.bf16 %v921_v32, %v921_v32 }
  0xc4   : > { %990 = vmatpush3.bf16.msra.mxu0 %v1396_v9 }
  0xc5   : > { %998 = vmatpush3.bf16.msra.mxu1 %v1385_v6  ;;  %1005 = vmatprep.subr.bf16.mxu0 %v1213_v2  ;;  %v595_v33 = vpop.permute.xlu1 %594 }
  0xc6   : > { %999 = vmatprep.subr.bf16.mxu1 %v1213_v2  ;;  %vm596_vm9 = vcmp.eq.s32.totalorder %v595_v33, %v1403_v15 }
  0xc7   : > { %992 = vmatmul.mubr.msk.bf16.vlgmr.msra.gmra.mxu0 %vm288_vm3, %v395_v25  ;;  %v923_v36 = vsel %vm596_vm9, 1.0, %v1213_v2 }
  0xc8   : > { %1006 = vmatpush3.bf16.msra.mxu0 %v1379_v5  ;;  %1011 = vmatprep.mubr.msk.bf16.mxu0 %vm1214_vm1, %v1213_v2  ;;  %v599_v37 = vpack.c.bf16 %v923_v36, %v923_v36 }
  0xc9   : > { %1000 = vmatpush3.bf16.msra.mxu1 %v1396_v9  ;;  %1007 = vmatprep.subr.bf16.mxu0 %v1213_v2 }
  0xca   : > { %1015 = vmatprep.subr.bf16.mxu1 %v1213_v2  ;;  %v646_v35 = vpop.permute.xlu1 %645 }
  0xcb   : > { %vm647_vm10 = vcmp.eq.s32.totalorder %v646_v35, %v1403_v15 }
  0xcc   : > { %1002 = vmatmul.mubr.msk.bf16.vlgmr.msra.gmra.mxu1 %vm288_vm3, %v446_v28  ;;  %1008 = vmatpush3.bf16.msra.mxu0 %v1385_v6  ;;  %v925_v38 = vsel %vm647_vm10, 1.0, %v1213_v2 }
  0xcd   : > { %1016 = vmatpush3.bf16.msra.mxu1 %v1379_v5  ;;  %1009 = vmatprep.subr.bf16.mxu0 %v1213_v2  ;;  %v650_v39 = vpack.c.bf16 %v925_v38, %v925_v38 }
  0xce   : > { %1017 = vmatprep.subr.bf16.mxu1 %v1213_v2  ;;  %1021 = vmatprep.mubr.msk.bf16.mxu1 %vm1214_vm1, %v1213_v2 }
  0xd0   : > { %1010 = vmatpush3.bf16.msra.mxu0 %v1396_v9 }
  0xd1   : > { %1018 = vmatpush3.bf16.msra.mxu1 %v1385_v6  ;;  %1025 = vmatprep.subr.bf16.mxu0 %v1213_v2 }
  0xd2   : > { %1019 = vmatprep.subr.bf16.mxu1 %v1213_v2 }
  0xd3   : > { %1012 = vmatmul.mubr.msk.bf16.vlgmr.msra.gmra.mxu0 %vm288_vm3, %v497_v31 }
  0xd4   : > { %1026 = vmatpush3.bf16.msra.mxu0 %v1379_v5  ;;  %1031 = vmatprep.mubr.msk.bf16.mxu0 %vm1214_vm1, %v1213_v2 }
  0xd5   : > { %1020 = vmatpush3.bf16.msra.mxu1 %v1396_v9  ;;  %1027 = vmatprep.subr.bf16.mxu0 %v1213_v2 }
  0xd6   : > { %1035 = vmatprep.subr.bf16.mxu1 %v1213_v2 }
  0xd8   : > { %1022 = vmatmul.mubr.msk.bf16.vlgmr.msra.gmra.mxu1 %vm288_vm3, %v548_v34  ;;  %1028 = vmatpush3.bf16.msra.mxu0 %v1385_v6 }
  0xd9   : > { %1036 = vmatpush3.bf16.msra.mxu1 %v1379_v5  ;;  %1029 = vmatprep.subr.bf16.mxu0 %v1213_v2 }
  0xda   : > { %1037 = vmatprep.subr.bf16.mxu1 %v1213_v2  ;;  %1041 = vmatprep.mubr.msk.bf16.mxu1 %vm1214_vm1, %v1213_v2 }
  0xdc   : > { %1030 = vmatpush3.bf16.msra.mxu0 %v1396_v9 }
  0xdd   : > { %1038 = vmatpush3.bf16.msra.mxu1 %v1385_v6 }
  0xde   : > { %1039 = vmatprep.subr.bf16.mxu1 %v1213_v2 }
  0xdf   : > { %1032 = vmatmul.mubr.msk.bf16.vlgmr.msra.gmra.mxu0 %vm288_vm3, %v599_v37 }
  0xe1   : > { %1040 = vmatpush3.bf16.msra.mxu1 %v1396_v9 }
  0xe4   : > { %1042 = vmatmul.mubr.msk.bf16.vlgmr.msra.gmra.mxu1 %vm288_vm3, %v650_v39 }
 0x17b   : > { %v330_v40 = vpop.f32.mrf.mxu0 }
 0x17c   : > { %337 = vst.msk [vmem:[#allocation2] sm:$0xff] %vm336_vm11, %v330_v40 }
 0x17d   : > { %v973_v41 = vpop.f32.mrf.mxu0 }
 0x17f   : > { %v333_v42 = vpop.f32.mrf.mxu0 }
 0x180   : > { %v382_v43 = vpop.f32.mrf.mxu1 }
 0x181   : > { %388 = vst.msk [vmem:[#allocation2 + $0x8] sm:$0xff] %vm336_vm11, %v382_v43  ;;  %v974_v44 = vpop.f32.mrf.mxu0 }
 0x182   : > { %v983_v45 = vpop.f32.mrf.mxu1 }
 0x183   : > { %v695_v17 = vld [vmem:[#allocation2] sm:$0xff] }
 0x184   : > { %v385_v46 = vpop.f32.mrf.mxu1 }
 0x186   : > { %v984_v47 = vpop.f32.mrf.mxu1 }
 0x187   : > { %v433_v48 = vpop.f32.mrf.mxu0 }
 0x188   : > { %439 = vst.msk [vmem:[#allocation2 + $0x10] sm:$0xff] %vm336_vm11, %v433_v48  ;;  %v696_v49 = vld [vmem:[#allocation2 + $0x8] sm:$0xff] }
 0x189   : > { %v993_v50 = vpop.f32.mrf.mxu0  ;;  %710 = vrot.lane.b32.xlu0 %v696_v49, %s1221_s11 }
 0x18b   : > { %v436_v51 = vpop.f32.mrf.mxu0 }
 0x18c   : > { %v484_v52 = vpop.f32.mrf.mxu1 }
 0x18d   : > { %490 = vst.msk [vmem:[#allocation2 + $0x18] sm:$0xff] %vm336_vm11, %v484_v52  ;;  %v994_v53 = vpop.f32.mrf.mxu0 }
 0x18e   : > { %v1003_v54 = vpop.f32.mrf.mxu1 }
 0x18f   : > { %v697_v55 = vld [vmem:[#allocation2 + $0x10] sm:$0xff] }
 0x190   : > { %712 = vrot.lane.b32.xlu1 %v697_v55, %s1221_s11  ;;  %v487_v56 = vpop.f32.mrf.mxu1 }
 0x192   : > { %v1004_v57 = vpop.f32.mrf.mxu1 }
 0x193   : > { %v535_v58 = vpop.f32.mrf.mxu0  ;;  %v927_v57 = vld [vmem:[%s1544_s3] ss:$0 sm:$0xff] }
 0x194   : > { %541 = vst.msk [vmem:[#allocation2 + $0x20] sm:$0xff] %vm336_vm11, %v535_v58  ;;  %753 = vrot.lane.b32.xlu1 %v697_v55, %s1222_s23  ;;  %v698_v59 = vld [vmem:[#allocation2 + $0x18] sm:$0xff] }
 0x195   : > { %v1013_v60 = vpop.f32.mrf.mxu0  ;;  %714 = vrot.lane.b32.xlu0 %v698_v59, %s1221_s11 }
 0x196   : > { %v799_v60 = vld [vmem:[%s1359_s15] sm:$0xff]  ;;  %s1148_s15 = sshll.u32 %s1224_s22, 4  ;;  %s1149_s15 = int_to_ptr.vmem [resolvable:$false] %s1148_s15 }
 0x197   : > { %v538_v61 = vpop.f32.mrf.mxu0  ;;  %s1150_s17 = scalar_lea.vmem %s1149_s15, 256  ;;  %p1151_p5 = scmp.lt.s32.totalorder %s818_s8, %s1149_s15 }
 0x198   : > { %v586_v62 = vpop.f32.mrf.mxu1 }
 0x199   : > { %592 = vst.msk [vmem:[#allocation2 + $0x28] sm:$0xff] %vm336_vm11, %v586_v62  ;;  %v1014_v63 = vpop.f32.mrf.mxu0  ;;  %755 = vrot.lane.b32.xlu0 %v698_v59, %s1222_s23 }
 0x19a   : > { %v1023_v0 = vpop.f32.mrf.mxu1 }
 0x19b   : > { %v699_v1 = vld [vmem:[#allocation2 + $0x20] sm:$0xff] }
 0x19c   : > { %716 = vrot.lane.b32.xlu1 %v699_v1, %s1221_s11  ;;  %v589_v2 = vpop.f32.mrf.mxu1 }
 0x19d   : > { %757 = vrot.lane.b32.xlu0 %v699_v1, %s1222_s23 }
 0x19e   : > { %v1024_v3 = vpop.f32.mrf.mxu1 }
 0x19f   : > { %v637_v4 = vpop.f32.mrf.mxu0 }
 0x1a0   : > { %643 = vst.msk [vmem:[#allocation2 + $0x30] sm:$0xff] %vm336_vm11, %v637_v4  ;;  %v700_v5 = vld [vmem:[#allocation2 + $0x28] sm:$0xff] }
 0x1a1   : > { %v1033_v6 = vpop.f32.mrf.mxu0  ;;  %759 = vrot.lane.b32.xlu0 %v700_v5, %s1222_s23  ;;  %718 = vrot.lane.b32.xlu1 %v700_v5, %s1221_s11 }
 0x1a3   : > { %v640_v7 = vpop.f32.mrf.mxu0 }
 0x1a4   : > { %v688_v8 = vpop.f32.mrf.mxu1 }
 0x1a5   : > { %694 = vst.msk [vmem:[#allocation2 + $0x38] sm:$0xff] %vm336_vm11, %v688_v8  ;;  %v1034_v9 = vpop.f32.mrf.mxu0 }
 0x1a6   : > { %v1043_v10 = vpop.f32.mrf.mxu1 }
 0x1a7   : > { %v701_v11 = vld [vmem:[#allocation2 + $0x30] sm:$0xff] }
 0x1a8   : > { %761 = vrot.lane.b32.xlu0 %v701_v11, %s1222_s23  ;;  %720 = vrot.lane.b32.xlu1 %v701_v11, %s1221_s11  ;;  %v691_v12 = vpop.f32.mrf.mxu1 }
 0x1aa   : > { %v1044_v14 = vpop.f32.mrf.mxu1 }
 0x1ac   : > { %v702_v15 = vld [vmem:[#allocation2 + $0x38] sm:$0xff]  ;;  %788 = vrot.lane.b32.xlu0 %v928_v13, %s1223_s16 }
 0x1ad   : > { %763 = vrot.lane.b32.xlu1 %v702_v15, %s1222_s23  ;;  %s1144_s23 = scalar_lea.vmem %s818_s8, 128 }
 0x1ae   : > { %p1145_p12 = scmp.ne.s32.totalorder %s818_s8, %s1144_s23  ;;  %p1152_p8 = scmp.lt.s32.totalorder %s1150_s17, %s1144_s23 }
 0x1b0   : > { %p1146_p1 = pnand %p1145_p12, %p1557_p13  ;;  %p1153_p10 = por %p1152_p8, %p1151_p5 }
 0x1b1   : > { %722 = vrot.lane.b32.xlu1 %v702_v15, %s1221_s11 }
 0x1b2   : > { %p1147_p3 = pneg %p1146_p1 }
 0x1b4   : > { %p1154_p2 = pnand %p1153_p10, %p1147_p3 }
 0x1fb   : > { %v711_v16 = vpop.permute.xlu0 %710 }
 0x1fc   : > { %v731_v19 = vadd.f32 %v711_v16, %v695_v17 }
 0x202   : > { %v713_v18 = vpop.permute.xlu1 %712 }
 0x203   : > { %v732_v20 = vadd.f32 %v713_v18, %v696_v49 }
 0x205   : > { %v738_v21 = vmax.f32 %v731_v19, %v732_v20 }
 0x206   : > { %v754_v24 = vpop.permute.xlu1 %753 }
 0x207   : > { %v715_v22 = vpop.permute.xlu0 %714  ;;  %v771_v36 = vadd.f32 %v754_v24, %v731_v19 }
 0x208   : > { %v733_v23 = vadd.f32 %v715_v22, %v697_v55 }
 0x20a   : > { %v739_v25 = vmax.f32 %v738_v21, %v733_v23 }
 0x20b   : > { %v756_v26 = vpop.permute.xlu0 %755 }
 0x20c   : > { %v772_v33 = vadd.f32 %v756_v26, %v732_v20 }
 0x20e   : > { %v717_v27 = vpop.permute.xlu1 %716  ;;  %v777_v38 = vmax.f32 %v771_v36, %v772_v33 }
 0x20f   : > { %v734_v28 = vadd.f32 %v717_v27, %v698_v59  ;;  %v758_v29 = vpop.permute.xlu0 %757 }
 0x210   : > { %v773_v37 = vadd.f32 %v758_v29, %v733_v23 }
 0x211   : > { %v740_v30 = vmax.f32 %v739_v25, %v734_v28 }
 0x212   : > { %v778_v43 = vmax.f32 %v777_v38, %v773_v37 }
 0x213   : > { %v719_v31 = vpop.permute.xlu1 %718  ;;  %v760_v35 = vpop.permute.xlu0 %759 }
 0x214   : > { %v735_v32 = vadd.f32 %v719_v31, %v699_v1  ;;  %v774_v39 = vadd.f32 %v760_v35, %v734_v28 }
 0x216   : > { %v741_v34 = vmax.f32 %v740_v30, %v735_v32  ;;  %v779_v46 = vmax.f32 %v778_v43, %v774_v39 }
 0x21a   : > { %v721_v40 = vpop.permute.xlu1 %720  ;;  %v762_v41 = vpop.permute.xlu0 %761 }
 0x21b   : > { %v736_v42 = vadd.f32 %v721_v40, %v700_v5  ;;  %v775_v44 = vadd.f32 %v762_v41, %v735_v32 }
 0x21d   : > { %v742_v45 = vmax.f32 %v741_v34, %v736_v42  ;;  %v780_v48 = vmax.f32 %v779_v46, %v775_v44 }
 0x21e   : > { %v789_v50 = vpop.permute.xlu0 %788 }
 0x21f   : > { %v764_v47 = vpop.permute.xlu1 %763 }
 0x220   : > { %v776_v49 = vadd.f32 %v764_v47, %v736_v42 }
 0x222   : > { %v781_v51 = vmax.f32 %v780_v48, %v776_v49 }
 0x223   : > { %v723_v54 = vpop.permute.xlu1 %722 }
 0x224   : > { %v791_v52 = vadd.f32 %v789_v50, %v781_v51  ;;  %v737_v55 = vadd.f32 %v723_v54, %v701_v11 }
 0x226   : > { %v792_v53 = vmax.f32 %v791_v52, 0.0  ;;  %v743_v56 = vmax.f32 %v742_v45, %v737_v55 }
 0x228   : > { %794 = vrot.lane.b32.xlu0 %v792_v53, %s1221_s11  ;;  %v751_v58 = vadd.f32 %v927_v57, %v743_v56  ;;  %s804_s11 = scalar_lea.sflag [#allocation5], %s1353_s13 }
 0x22a   : > { %v752_v59 = vmax.f32 %v751_v58, 0.0 }
 0x29a   : > { %v795_v61 = vpop.permute.xlu0 %794 }
 0x29b   : > { %v798_v62 = vsel %vm797_vm12, %v752_v59, %v795_v61 }
 0x29c   : > { %v800_v63 = vadd.f32 %v799_v60, %v798_v62 }
 0x29e   : > { %802 = vst.msk [vmem:[%s252_s28] sm:$0xff] %vm801_vm13, %v800_v63 }
 0x29f   : > { %1157 = shalt.err (!%p1154_p2)
}
 0x2a0   : > { %s1158_s12 = scalar_lea.hbm %s815_s10, 128  ;;  %s1162_s16 = scalar_lea.hbm %s1546_s5, 256 }
 0x2a1   : > { %p1159_p4 = scmp.ne.s32.totalorder %s815_s10, %s1158_s12  ;;  %p1163_p0 = scmp.lt.s32.totalorder %s815_s10, %s1546_s5 }
 0x2a2   : > { %p1164_p6 = scmp.lt.s32.totalorder %s1162_s16, %s1158_s12 }
 0x2a3   : > { %p1160_p9 = pnand %p1159_p4, %p1557_p13 }
 0x2a4   : > { %p1165_p11 = por %p1164_p6, %p1163_p0 }
 0x2a5   : > { %p1161_p7 = pneg %p1160_p9 }
 0x2a7   : > { %p1166_p12 = pnand %p1165_p11, %p1161_p7 }
 0x2a9   : > { %1169 = shalt.err (!%p1166_p12)
}
 0x2aa   : > { %1047 = dma.vmem_to_hbm [thread:$0]  (%p1557_p13), %s818_s8, 128, %s815_s10, %s804_s11  }
 0x2ab PF: > { %s829_s29 = sand.u32 1, %s1196_s18   ;;  %p1558_p1 = scmp.ne.s32.totalorder %s1552_s6, 0 }
 0x2ac   : > { %p1559_p3 = scmp.ge.s32.totalorder %s1208_s21, 2  ;;  %s830_s28 = scalar_lea.sflag [#allocation5], %s829_s29 }
 0x2ae   : > { %p1054_p5 = pnand %p1559_p3, %p1558_p1 }
 0x2b0   : > { %p1055_p8 = pneg %p1054_p5 }
 0x2b2   : > { %1191 = dma.done.wait (%p1055_p8), %s830_s28, 128  }
 0x2b3   : > { %1193 = vsyncadd (%p1055_p8), %s830_s28, 4294967168  ;;  %p18_p10 = scmp.ge.s32.totalorder %s1280_s24, 4   ;;  %s1560_s18 = smov %s1200_s19 }
 0x2b4   : > { %s1561_s19 = smov %s1204_s20  ;;  %s1562_s20 = smov %s1292_s27 }
 0x2b5   : > { %s1563_s21 = smov %s1280_s24  ;;  %20 = sbr.rel (!%p18_p10) target bundleno = 5 (0x5), region = 88 }
 0x2ba   :  { %835 = vsyncpa [#allocation4], 1 }
 0x2bb   :  { %837 = vsyncpa [#allocation4 + $0x1], 1 }
 0x2bc   :  { %838 = vsyncpa [#allocation5], 1 }
 0x2bd   :  { %840 = vsyncpa [#allocation5 + $0x1], 1 }

</bundles_post_ra>
